<compile_context>
chip_gen: v7x
topology: tpu7x:2x2x1
jax: 0.10.0
libtpu: 0.0.40
codegen_flags: <defaults>
</compile_context>

<pallas_src>
import math
import functools

import jax
import jax.numpy as jnp
from jax import lax
from jax.experimental import pallas as pl
from jax.experimental.pallas import tpu as pltpu


# Conservative resident-table budget: must fit comfortably even on v7x
# (64 MiB physical VMEM) together with double-buffered output blocks.
_RESIDENT_TABLE_BYTES_LIMIT = 40 * 1024 * 1024


def _round_up(x, m):
    return (x + m - 1) // m * m


def _embed_kernel_resident(ids_ref, tab_ref, o_ref, *, tb, scale):
    """Gather TB rows from the VMEM-resident table, scale, write a dense block.

    ids_ref : SMEM, (n_pad,) int32 token ids (scalar prefetch)
    tab_ref : VMEM, (num_tokens, emb_size) -- resident across all grid steps
    o_ref   : VMEM, (tb, emb_size) output block for this grid step
    """
    base = pl.program_id(0) * tb

    def body(t, carry):
        tok = ids_ref[base + t]                       # scalar id from SMEM
        o_ref[pl.ds(t, 1), :] = tab_ref[pl.ds(tok, 1), :]
        return carry

    lax.fori_loop(0, tb, body, 0, unroll=False)
    # Dense VPU scaling over the whole (tb, emb_size) block (full vregs).
    o_ref[...] = o_ref[...] * scale


def _embed_kernel_rowgather(ids_ref, row_ref, o_ref, *, scale):
    """Fallback (huge vocab): row already DMA'd by the data-dependent index_map."""
    o_ref[...] = row_ref[...] * scale


def token_embedding(indices, emb_table, *, block_tokens=256):
    """Pallas equivalent of TokenEmbedding.forward: embedding(ids) * sqrt(emb_size)."""
    num_tokens, emb_size = emb_table.shape
    scale = float(math.sqrt(emb_size))

    orig_shape = indices.shape
    flat_ids = indices.reshape(-1).astype(jnp.int32)          # mimic .long()
    flat_ids = jnp.clip(flat_ids, 0, num_tokens - 1)          # bounds safety (no OOB DMA)
    n = flat_ids.shape[0]

    table_bytes = num_tokens * emb_size * emb_table.dtype.itemsize

    if table_bytes <= _RESIDENT_TABLE_BYTES_LIMIT:
        # --- Resident-table path: table DMA'd to VMEM once, in-kernel gather. ---
        tb = min(block_tokens, _round_up(n, 8))               # sublane-dense (>=8 rows)
        n_pad = _round_up(n, tb)
        ids_pad = jnp.pad(flat_ids, (0, n_pad - n))           # padded ids are valid (0)
        grid = (n_pad // tb,)

        out_block_bytes = tb * emb_size * emb_table.dtype.itemsize
        vmem_limit = min(
            100 * 1024 * 1024,
            max(32 * 1024 * 1024, table_bytes + 4 * out_block_bytes + (2 << 20)),
        )

        out_flat = pl.pallas_call(
            functools.partial(_embed_kernel_resident, tb=tb, scale=scale),
            out_shape=jax.ShapeDtypeStruct((n_pad, emb_size), emb_table.dtype),
            grid_spec=pltpu.PrefetchScalarGridSpec(
                num_scalar_prefetch=1,
                grid=grid,
                in_specs=[
                    # Whole table, constant block index -> stays resident in VMEM.
                    pl.BlockSpec((num_tokens, emb_size), lambda i, ids: (0, 0)),
                ],
                out_specs=pl.BlockSpec((tb, emb_size), lambda i, ids: (i, 0)),
            ),
            compiler_params=pltpu.CompilerParams(
                dimension_semantics=("parallel",),
                vmem_limit_bytes=int(vmem_limit),
            ),
        )(ids_pad, emb_table)
        out_flat = out_flat[:n]
    else:
        # --- Large-vocab fallback: per-token data-dependent BlockSpec gather. ---
        # TODO(synk): for very large vocabularies, a batched manual
        # pltpu.make_async_copy gather (TB rows per step into a VMEM scratch)
        # would also amortize the per-grid-step overhead.
        out_flat = pl.pallas_call(
            functools.partial(_embed_kernel_rowgather, scale=scale),
            out_shape=jax.ShapeDtypeStruct((n, emb_size), emb_table.dtype),
            grid_spec=pltpu.PrefetchScalarGridSpec(
                num_scalar_prefetch=1,
                grid=(n,),
                in_specs=[
                    pl.BlockSpec((1, emb_size), lambda i, ids: (ids[i], 0),
                                 pipeline_mode=pl.Buffered(4)),
                ],
                out_specs=pl.BlockSpec((1, emb_size), lambda i, ids: (i, 0)),
            ),
            compiler_params=pltpu.CompilerParams(
                dimension_semantics=("parallel",),
            ),
        )(flat_ids, emb_table)

    return out_flat.reshape(*orig_shape, emb_size)


if __name__ == "__main__":
    num_tokens = 64
    emb_size = 128
    batch, seq = 2, 8

    key = jax.random.PRNGKey(0)
    k_emb, k_idx = jax.random.split(key)

    # nn.Embedding default init: N(0, 1)
    emb_table = jax.random.normal(k_emb, (num_tokens, emb_size), dtype=jnp.float32)
    indices = jax.random.randint(k_idx, (batch, seq), 0, num_tokens, dtype=jnp.int32)

    out = token_embedding(indices, emb_table)
    out = jax.block_until_ready(out)

    # Pure-JAX reference check.
    ref = jnp.take(emb_table, indices, axis=0) * math.sqrt(emb_size)
    assert out.shape == (batch, seq, emb_size), out.shape
    assert jnp.allclose(out, ref, atol=1e-5, rtol=1e-5), "mismatch vs reference"

    print("KERNEL_OK")
</pallas_src>

<mosaic_0001>
module attributes {stable_mosaic.version = 11 : i64} {
  func.func @_embed_kernel_resident(%arg0: i32, %arg1: memref<16xi32, #tpu.memory_space<smem>>, %arg2: memref<64x128xf32, #tpu.memory_space<vmem>>, %arg3: memref<16x128xf32, #tpu.memory_space<vmem>>) attributes {dimension_semantics = [#tpu.dimension_semantics<parallel>], iteration_bounds = array<i64: 1>, scalar_prefetch = 1 : i64, scratch_operands = 0 : i64, tpu.core_type = #tpu.core_type<tc>, window_params = [{pipeline_mode = #tpu.pipeline_mode<synchronous>, transform_indices = @transform_0, window_bounds = array<i64: 64, 128>}, {transform_indices = @transform_1, window_bounds = array<i64: 16, 128>}]} {
    %c16_i32 = arith.constant 16 : i32
    %0 = arith.muli %arg0, %c16_i32 : i32
    %c0_i32 = arith.constant 0 : i32
    %c16_i32_0 = arith.constant 16 : i32
    %1 = arith.addi %c0_i32, %c16_i32_0 : i32
    %c1_i32 = arith.constant 1 : i32
    scf.for %arg4 = %c0_i32 to %1 step %c1_i32  : i32 {
      %6 = arith.addi %0, %arg4 : i32
      %7 = arith.index_cast %6 : i32 to index
      %8 = memref.load %arg1[%7] : memref<16xi32, #tpu.memory_space<smem>>
      %9 = arith.index_cast %8 : i32 to index
      %c0_5 = arith.constant 0 : index
      %10 = vector.load %arg2[%9, %c0_5] : memref<64x128xf32, #tpu.memory_space<vmem>>, vector<1x128xf32>
      %11 = arith.index_cast %arg4 : i32 to index
      %c0_6 = arith.constant 0 : index
      %12 = vector.load %arg3[%11, %c0_6] : memref<16x128xf32, #tpu.memory_space<vmem>>, vector<1x128xf32>
      tpu.vector_store %arg3[%11, %c0_6], %10 {strides = array<i32>} : memref<16x128xf32, #tpu.memory_space<vmem>>, vector<1x128xf32>,
    }
    %c16_i32_1 = arith.constant 16 : i32
    %c0 = arith.constant 0 : index
    %c0_2 = arith.constant 0 : index
    %2 = vector.load %arg3[%c0, %c0_2] : memref<16x128xf32, #tpu.memory_space<vmem>>, vector<16x128xf32>
    %cst = arith.constant 11.3137083 : f32
    %3 = vector.broadcast %cst : f32 to vector<16x128xf32>
    %4 = arith.mulf %2, %3 : vector<16x128xf32>
    %c0_3 = arith.constant 0 : index
    %c0_4 = arith.constant 0 : index
    %5 = vector.load %arg3[%c0_3, %c0_4] : memref<16x128xf32, #tpu.memory_space<vmem>>, vector<16x128xf32>
    tpu.vector_store %arg3[%c0_3, %c0_4], %4 {strides = array<i32>} : memref<16x128xf32, #tpu.memory_space<vmem>>, vector<16x128xf32>,
    return
  }
  func.func @transform_0(%arg0: i32, %arg1: memref<16xi32, #tpu.memory_space<smem>>) -> (i32, i32) {
    %c0_i32 = arith.constant 0 : i32
    %c0_i32_0 = arith.constant 0 : i32
    %c0_i32_1 = arith.constant 0 : i32
    return %c0_i32, %c0_i32_0 : i32, i32
  }
  func.func @transform_1(%arg0: i32, %arg1: memref<16xi32, #tpu.memory_space<smem>>) -> (i32, i32) {
    %c0_i32 = arith.constant 0 : i32
    %c0_i32_0 = arith.constant 0 : i32
    return %arg0, %c0_i32 : i32, i32
  }
}

</mosaic_0001>

<bundles_post_ra>
// kernel: tpu_custom_call.1
= control target key start
LH: loop header
LB: loop body
LE: loop exit
PB: predicated region body
PF: predicated region fallthrough
CT: control target
= control target key end

     0   :  { %s214_s0 = inlined_call_operand.hbm [shape: s32[16], index: 0, kind: input, shape index: {}]   ;;  %s215_s1 = inlined_call_operand.hbm [shape: f32[64,128], index: 1, kind: input, shape index: {}]   ;;  %s216_s2 = inlined_call_operand.hbm [shape: f32[16,128], index: 2, kind: output, shape index: {}]  }
   0x1   :  { %s84_s11 = scalar_lea.hbm %s214_s0, 16 }
   0x2   :  { %p85_p0 = scmp.ne.s32.totalorder %s214_s0, %s84_s11  ;;  %p88_p1 = scmp.lt.u32.totalorder %s84_s11, %s214_s0 }
   0x4   :  { %p90_p2 = pnand %p88_p1, %p85_p0 }
   0x6   :  { %93 = shalt.err (!%p90_p2)  }
   0x7   :  { %s152_s16 = smov [#allocation3]  }
   0x8   :  { %8 = dma.hbm_to_smem %s214_s0, 16, %s152_s16, [#allocation2] }
   0x9   :  { %142 = dma.done.wait [#allocation2], 16 }
   0xa   :  { %143 = vsyncadd [#allocation2], 4294967280 }
   0xb   :  { %10 = sfence }
   0xc   :  { %11 = vsyncpa [#allocation5], 0 }
   0xd   :  { %12 = vsyncpa [#allocation6], 0  ;;  %s153_s19 = smov [#allocation4]   ;;  %s94_s23 = scalar_lea.hbm %s215_s1, 1024 }
   0xe   :  { %s18_s20 = sshll.u32 %s153_s19, 4  ;;  %p95_p3 = scmp.ne.s32.totalorder %s215_s1, %s94_s23  ;;  %s19_s20 = int_to_ptr.vmem [resolvable:$true] %s18_s20 }
   0xf   :  { %p98_p4 = scmp.lt.u32.totalorder %s94_s23, %s215_s1 }
  0x11   :  { %p100_p5 = pnand %p98_p4, %p95_p3 }
  0x13   :  { %103 = shalt.err (!%p100_p5)
}
  0x14   :  { %s104_s0 = scalar_lea.vmem %s19_s20, 1024  ;;  %p109_p7 = scmp.lt.s32.totalorder %s19_s20, %s19_s20 }
  0x15   :  { %p105_p6 = scmp.ne.s32.totalorder %s19_s20, %s104_s0  ;;  %p110_p8 = scmp.lt.s32.totalorder %s104_s0, %s104_s0 }
  0x17   :  { %p111_p9 = por %p110_p8, %p109_p7 }
  0x19   :  { %p112_p10 = pnand %p111_p9, %p105_p6 }
  0x1b   :  { %115 = shalt.err (!%p112_p10)
}
  0x1c   :  { %s154_s28 = smov 128   ;;  %s155_s29 = smov 8  }
  0x1d   :  { %24 = dma.hbm_to_vmem [thread:$0]  %s215_s1, 1024, %s19_s20, [#allocation5], %s154_s28, %s154_s28, %s155_s29  }
  0x1e   :  { %144 = dma.done.wait [#allocation5], 1024  }
  0x1f   :  { %145 = vsyncadd [#allocation5], 4294966272  ;;  %s148_s4 = smov 0  }
  0x20 LB: > { %s36_s5 = sld [smem:[#allocation3 + %s150_s4]]  ;;  %s39_s7 = scalar_lea.vmem [#allocation7], %s150_s4  ;;  %s150_s4 = sphi %s148_s4, %s34_s4  }
  0x21   : > { %s34_s4 = sadd.s32 1, %s150_s4  }
  0x22   : > { %p31_p11 = scmp.ge.s32.totalorder %s34_s4, 16  }
  0x23   :  { %s156_s1 = smov (%p31_p11), [#allocation7]  }
  0x24   :  { %33 = sbr.rel (!%p31_p11) target bundleno = 32 (0x20), region = 37  ;;  %s52_s8 = sshll.u32 (%p31_p11), %s156_s1, 4  ;;  %s53_s8 = int_to_ptr.vmem [resolvable:$true] %s52_s8 }
  0x25   :  { %s116_s9 = scalar_lea.vmem (%p31_p11), %s53_s8, 256  ;;  %p121_p13 = scmp.lt.s32.totalorder (%p31_p11), %s53_s8, %s53_s8 }
  0x26   : > { %s37_s6 = scalar_lea.vmem [#allocation4], %s36_s5  ;;  %p117_p12 = scmp.ne.s32.totalorder (%p31_p11), %s53_s8, %s116_s9 }
  0x27   : > { %v38_v0 = vld [vmem:[%s37_s6] sm:$0x1]  ;;  %p122_p0 = scmp.lt.s32.totalorder (%p31_p11), %s116_s9, %s116_s9 }
  0x28   : > { %40 = vst [vmem:[%s39_s7] sm:$0x1] %v38_v0 }
  0x29   :  { %p123_p1 = por (%p31_p11), %p122_p0, %p121_p13 }
  0x2b   :  { %p124_p2 = pnand %p123_p1, %p117_p12 }
  0x2f   :  { %v41_v1 = vld [vmem:[#allocation7] sm:$0xff]  ;;  %v42_v2 = vld [vmem:[#allocation7 + $0x8] sm:$0xff] }
  0x30   :  { %v43_v3 = vmul.f32 11.313708, %v41_v1  ;;  %v44_v4 = vmul.f32 11.313708, %v42_v2 }
  0x32   :  { %45 = vst [vmem:[#allocation7] sm:$0xff] %v43_v3  ;;  %46 = vst [vmem:[#allocation7 + $0x8] sm:$0xff] %v44_v4 }
  0x33   :  { %127 = shalt.err (!%p124_p2)
}
  0x34   :  { %s128_s12 = scalar_lea.hbm %s216_s2, 256 }
  0x35   :  { %p129_p3 = scmp.ne.s32.totalorder %s216_s2, %s128_s12  ;;  %p132_p4 = scmp.lt.u32.totalorder %s128_s12, %s216_s2 }
  0x37   :  { %p134_p5 = pnand %p132_p4, %p129_p3 }
  0x39   :  { %137 = shalt.err (!%p134_p5)
}
  0x3a   :  { %58 = dma.vmem_to_hbm [thread:$0]  %s53_s8, 256, %s216_s2, [#allocation6], %s154_s28, %s154_s28, %s155_s29  }
  0x3b   :  { %146 = dma.done.wait [#allocation6], 256  }
  0x3c   :  { %147 = vsyncadd [#allocation6], 4294967040 }
  0x3d   :  { %62 = vsyncpa [#allocation5], 1 }
  0x3e   :  { %63 = vsyncpa [#allocation6], 1 }

</bundles_post_ra>
